<compile_context>
chip_gen: v7x
topology: tpu7x:2x2x1
jax: 0.10.0
libtpu: 0.0.40
codegen_flags: <defaults>
</compile_context>

<pallas_src>
import functools

import jax
import jax.numpy as jnp
from jax.experimental import pallas as pl
from jax.experimental.pallas import tpu as pltpu


def _conv1x1_kernel(x_ref, w_ref, b_ref, o_ref):
    # x_ref : (1, C_in, T)   -- one batch element, one lane-dense spatial tile
    # w_ref : (C_out, C_in)  -- resident (constant index_map), DMA'd once
    # b_ref : (C_out, 1)
    # o_ref : (1, C_out, T)
    x = x_ref[0]                                   # (C_in, T)
    w = w_ref[...]                                 # (C_out, C_in)
    b = b_ref[...]                                 # (C_out, 1)
    acc = jnp.dot(w, x, preferred_element_type=jnp.float32) + b
    o_ref[0] = acc.astype(o_ref.dtype)


def _round_up(v, m):
    return ((v + m - 1) // m) * m


@functools.lru_cache(maxsize=1)
def _vmem_plan():
    """Return (x-tile double-buffer budget bytes, vmem_limit_bytes or None)."""
    phys = None
    try:
        info = pltpu.get_tpu_info()
        for name in ("vmem_capacity_bytes", "vmem_size_bytes", "vmem_bytes"):
            phys = getattr(info, name, None)
            if phys is not None:
                break
    except Exception:
        phys = None
    if phys is None:
        # Unknown chip: stay under every generation's default scoped limit.
        return 12 * 1024 * 1024, None
    if phys >= 100 * 1024 * 1024:
        # v5e / v6e: 128 MiB physical VMEM -> fat tiles + explicit scoped limit.
        return 48 * 1024 * 1024, 64 * 1024 * 1024
    # v7x-class (64 MiB): keep the x double-buffer well under half of VMEM.
    return 24 * 1024 * 1024, 32 * 1024 * 1024


def _pick_spatial_tile(HW, batch, c_in, itemsize, budget_bytes):
    """Largest lane-dense (multiple-of-128) tile whose double-buffered x slab
    fits the per-chip budget.  With batch == 1, force an even, balanced tile
    count so both v7x TensorCores get equal work (no cost on v5e/v6e)."""
    hw_ceil = _round_up(HW, 128)
    cap = max(128, (budget_bytes // (2 * c_in * itemsize)) // 128 * 128)
    T = min(cap, hw_ceil)
    if batch == 1 and hw_ceil >= 256:
        n_tiles = max(2, pl.cdiv(hw_ceil, T))
        if n_tiles % 2:
            n_tiles += 1
        T = _round_up(pl.cdiv(hw_ceil, n_tiles), 128)
    if T > HW:
        # Single tile covering the whole map: use the exact extent (legal for
        # BlockSpec since it equals the full array dim) instead of a padded one.
        T = HW
    return T


@functools.partial(jax.jit, static_argnames=("phase",))
def class_head(x, weight, bias, phase="train"):
    """x: (N, C_in, H, W) NCHW.  weight: (C_out, C_in).  bias: (C_out,)."""
    N, C_in, H, W = x.shape
    C_out = weight.shape[0]
    HW = H * W

    budget, vmem_limit = _vmem_plan()
    T = _pick_spatial_tile(HW, N, C_in, jnp.dtype(x.dtype).itemsize, budget)
    grid = (N, pl.cdiv(HW, T))

    x_flat = x.reshape(N, C_in, HW)        # free view on contiguous NCHW input
    b2d = bias.reshape(C_out, 1)

    cp_kwargs = dict(dimension_semantics=("parallel", "parallel"))
    if vmem_limit is not None:
        cp_kwargs["vmem_limit_bytes"] = vmem_limit

    # TODO(synk): fuse the sibling BboxHead/LandmarkHead 1x1 convs by stacking
    # their weights into one (6 + 4A + 10A, C_in) matrix so the feature map is
    # streamed from HBM only once for all three heads.
    out_flat = pl.pallas_call(
        _conv1x1_kernel,
        out_shape=jax.ShapeDtypeStruct((N, C_out, HW), x.dtype),
        grid_spec=pltpu.PrefetchScalarGridSpec(
            num_scalar_prefetch=0,
            grid=grid,
            in_specs=[
                pl.BlockSpec((1, C_in, T), lambda n, j: (n, 0, j)),
                pl.BlockSpec((C_out, C_in), lambda n, j: (0, 0)),
                pl.BlockSpec((C_out, 1), lambda n, j: (0, 0)),
            ],
            out_specs=pl.BlockSpec((1, C_out, T), lambda n, j: (n, 0, j)),
        ),
        compiler_params=pltpu.CompilerParams(**cp_kwargs),
    )(x_flat, weight, b2d)

    if phase == "train":
        # Matches torch's out.reshape(N, -1, 2) on the contiguous NCHW output
        # (this module does NOT permute to NHWC first).
        return out_flat.reshape(N, -1, 2)
    return out_flat.reshape(N, C_out, H, W)


def _reference(x, weight, bias, phase="train"):
    """Pure-JAX reference of the PyTorch forward (for a sanity check)."""
    out = jnp.einsum("nchw,oc->nohw", x, weight) + bias[None, :, None, None]
    if phase == "train":
        return out.reshape(out.shape[0], -1, 2)
    return out


if __name__ == "__main__":
    key = jax.random.PRNGKey(0)
    num_anchors = 3
    C_out = num_anchors * 2  # 6

    # Case 1: batch=2, 128-aligned spatial map (16x16 -> HW=256).
    N, C_in, H, W = 2, 64, 16, 16
    kx, kw, kb, kx2 = jax.random.split(key, 4)
    x = jax.random.normal(kx, (N, C_in, H, W), dtype=jnp.float32)
    bound = 1.0 / (C_in ** 0.5)
    weight = jax.random.uniform(kw, (C_out, C_in), jnp.float32, -bound, bound)
    bias = jax.random.uniform(kb, (C_out,), jnp.float32, -bound, bound)

    out = jax.block_until_ready(class_head(x, weight, bias, phase="train"))
    assert out.shape == (N, C_out * H * W // 2, 2), out.shape
    ref = _reference(x, weight, bias, phase="train")
    assert jnp.allclose(out, ref, atol=1e-4, rtol=1e-4)

    out_test = jax.block_until_ready(class_head(x, weight, bias, phase="test"))
    ref_test = _reference(x, weight, bias, phase="test")
    assert out_test.shape == (N, C_out, H, W)
    assert jnp.allclose(out_test, ref_test, atol=1e-4, rtol=1e-4)

    # Case 2: batch=1, ragged spatial map (20x20 -> HW=400).  Exercises the
    # masked partial last block and the batch-1 balanced two-tile split.
    N2, C_in2, H2, W2 = 1, 32, 20, 20
    x2 = jax.random.normal(kx2, (N2, C_in2, H2, W2), dtype=jnp.float32)
    bound2 = 1.0 / (C_in2 ** 0.5)
    kw2, kb2 = jax.random.split(kw, 2)
    weight2 = jax.random.uniform(kw2, (C_out, C_in2), jnp.float32, -bound2, bound2)
    bias2 = jax.random.uniform(kb2, (C_out,), jnp.float32, -bound2, bound2)

    out2 = jax.block_until_ready(class_head(x2, weight2, bias2, phase="train"))
    assert out2.shape == (N2, C_out * H2 * W2 // 2, 2), out2.shape
    ref2 = _reference(x2, weight2, bias2, phase="train")
    assert jnp.allclose(out2, ref2, atol=1e-4, rtol=1e-4)

    print("KERNEL_OK")
</pallas_src>

<mosaic_0001>
module attributes {stable_mosaic.version = 11 : i64} {
  func.func @_conv1x1_kernel(%arg0: i32, %arg1: i32, %arg2: memref<1x64x256xf32, #tpu.memory_space<vmem>>, %arg3: memref<6x64xf32, #tpu.memory_space<vmem>>, %arg4: memref<6x1xf32, #tpu.memory_space<vmem>>, %arg5: memref<1x6x256xf32, #tpu.memory_space<vmem>>) attributes {dimension_semantics = [#tpu.dimension_semantics<parallel>, #tpu.dimension_semantics<parallel>], iteration_bounds = array<i64: 2, 1>, scalar_prefetch = 0 : i64, scratch_operands = 0 : i64, tpu.core_type = #tpu.core_type<tc>, window_params = [{transform_indices = @transform_0, window_bounds = array<i64: 1, 64, 256>}, {pipeline_mode = #tpu.pipeline_mode<synchronous>, transform_indices = @transform_1, window_bounds = array<i64: 6, 64>}, {pipeline_mode = #tpu.pipeline_mode<synchronous>, transform_indices = @transform_2, window_bounds = array<i64: 6, 1>}, {transform_indices = @transform_3, window_bounds = array<i64: 1, 6, 256>}]} {
    %c0 = arith.constant 0 : index
    %c0_0 = arith.constant 0 : index
    %c0_1 = arith.constant 0 : index
    %0 = vector.load %arg2[%c0, %c0_0, %c0_1] : memref<1x64x256xf32, #tpu.memory_space<vmem>>, vector<1x64x256xf32>
    %1 = vector.shape_cast %0 : vector<1x64x256xf32> to vector<64x256xf32>
    %c0_2 = arith.constant 0 : index
    %c0_3 = arith.constant 0 : index
    %2 = vector.load %arg3[%c0_2, %c0_3] : memref<6x64xf32, #tpu.memory_space<vmem>>, vector<6x64xf32>
    %c0_4 = arith.constant 0 : index
    %c0_5 = arith.constant 0 : index
    %3 = vector.load %arg4[%c0_4, %c0_5] : memref<6x1xf32, #tpu.memory_space<vmem>>, vector<6x1xf32>
    %cst = arith.constant dense<0.000000e+00> : vector<6x256xf32>
    %4 = tpu.matmul %2, %1, %cst {dimension_numbers = #tpu.dot_dimension_numbers<[1], [0], [0], [1], [0, 0, 1, 1], [], []>} : vector<6x64xf32>, vector<64x256xf32>, vector<6x256xf32> -> vector<6x256xf32>
    %5 = vector.broadcast %3 : vector<6x1xf32> to vector<6x256xf32>
    %6 = arith.addf %4, %5 : vector<6x256xf32>
    %c0_6 = arith.constant 0 : index
    %c0_7 = arith.constant 0 : index
    %c0_8 = arith.constant 0 : index
    %7 = vector.load %arg5[%c0_6, %c0_7, %c0_8] : memref<1x6x256xf32, #tpu.memory_space<vmem>>, vector<1x6x256xf32>
    %8 = vector.shape_cast %7 : vector<1x6x256xf32> to vector<6x256xf32>
    %9 = vector.shape_cast %6 : vector<6x256xf32> to vector<1x6x256xf32>
    tpu.vector_store %arg5[%c0_6, %c0_7, %c0_8], %9 {strides = array<i32>} : memref<1x6x256xf32, #tpu.memory_space<vmem>>, vector<1x6x256xf32>,
    return
  }
  func.func @transform_0(%arg0: i32, %arg1: i32) -> (i32, i32, i32) {
    %c0_i32 = arith.constant 0 : i32
    %c0_i32_0 = arith.constant 0 : i32
    return %arg0, %c0_i32, %arg1 : i32, i32, i32
  }
  func.func @transform_1(%arg0: i32, %arg1: i32) -> (i32, i32) {
    %c0_i32 = arith.constant 0 : i32
    %c0_i32_0 = arith.constant 0 : i32
    %c0_i32_1 = arith.constant 0 : i32
    return %c0_i32, %c0_i32_0 : i32, i32
  }
  func.func @transform_2(%arg0: i32, %arg1: i32) -> (i32, i32) {
    %c0_i32 = arith.constant 0 : i32
    %c0_i32_0 = arith.constant 0 : i32
    %c0_i32_1 = arith.constant 0 : i32
    return %c0_i32, %c0_i32_0 : i32, i32
  }
  func.func @transform_3(%arg0: i32, %arg1: i32) -> (i32, i32, i32) {
    %c0_i32 = arith.constant 0 : i32
    %c0_i32_0 = arith.constant 0 : i32
    return %arg0, %c0_i32, %arg1 : i32, i32, i32
  }
}

</mosaic_0001>

<bundles_post_ra>
// kernel: class_head.1
= control target key start
LH: loop header
LB: loop body
LE: loop exit
PB: predicated region body
PF: predicated region fallthrough
CT: control target
= control target key end

     0   :  { %s500_s12 = smov 0   ;;  %s502_s13 = smov 0   ;;  %s543_s0 = inlined_call_operand.vmem [shape: f32[2,64,256], index: 0, kind: input, shape index: {}]   ;;  %s544_s1 = inlined_call_operand.vmem [shape: f32[6,64], index: 1, kind: input, shape index: {}]   ;;  %s545_s2 = inlined_call_operand.vmem [shape: f32[6,1], index: 2, kind: input, shape index: {}]   ;;  %s546_s3 = inlined_call_operand.vmem [shape: f32[2,6,256], index: 3, kind: output, shape index: {}]  }
   0x1   :  { %s504_s14 = smov 0  }
   0x2 LB: > { %s25_s15 = sadd.s32 1, %s472_s13  ;;  %p401_p0 = scmp.ge.s32.totalorder %s476_s14, 1  ;;  %s476_s14 = sphi %s504_s14, %s13_s14   ;;  %s472_s13 = sphi %s502_s13, %s548_s13   ;;  %s468_s12 = sphi %s500_s12, %s547_s12  }
   0x3   : > { %p27_p1 = scmp.ge.s32.totalorder %s25_s15, 2  ;;  %p158_p2 = scmp.lt.s32.totalorder %s476_s14, 3 }
   0x5   : > { %s550_s15 = smov (%p27_p1, %s25_s15), 0  ;;  %p159_p3 = pnand %p401_p0, %p158_p2 }
   0x6   : > { %p191_p4 = scmp.lt.s32.totalorder (!%p159_p3), %s468_s12, 1  ;;  %v478_v0 = vmov (!%p159_p3), 0.0   ;;  %v479_v1 = vmov (!%p159_p3), 0   ;;  %v227_v2 = vld [vmem:[%s545_s2] sm:$0x3f] (!%p159_p3)  ;;  %vm233_vm0 = vcmask (!%p159_p3), 523264  }
   0x7   : > { %162 = sbr.rel (%p159_p3) target bundleno = 252 (0xfc), region = 32  ;;  %301 = vmatprep.mubr.f32.mxu0 (!%p159_p3), %v478_v0  ;;  %453 = vset.pattern.permute.xlu0 (!%p159_p3), %v479_v1  ;;  %v226_v27 = vld [vmem:[%s544_s1] sm:$0x3f] (!%p159_p3) }
   0x8   : > { %230 = vperm.xlu0 (!%p159_p3), %453, %v227_v2  }
   0xe   : > { %s552_s12 = smov (!%p191_p4, %s468_s12), 1 }
   0xf   : > { %s409_s18 = sshll.u32 %s552_s12, 7  ;;  %s410_s24 = sshll.u32 %s552_s12, 4 }
  0x10   : > { %s198_s21 = scalar_lea.vmem %s543_s0, %s409_s18  ;;  %s208_s27 = scalar_lea.vmem %s546_s3, %s410_s24 }
  0x11   : > { %v211_v3 = vld [vmem:[%s198_s21 + $0x8] sm:$0xff]  ;;  %v213_v4 = vld [vmem:[%s198_s21 + $0x18] sm:$0xff]  ;;  %v210_v5 = vld [vmem:[%s198_s21] sm:$0xff] }
  0x12   : > { %v411_v6 = vpack.c.bf16 %v213_v4, %v211_v3  ;;  %v212_v7 = vld [vmem:[%s198_s21 + $0x10] sm:$0xff]  ;;  %v215_v8 = vld [vmem:[%s198_s21 + $0x28] sm:$0xff]  ;;  %v217_v9 = vld [vmem:[%s198_s21 + $0x38] sm:$0xff] }
  0x13   : > { %v413_v10 = vpack.c.bf16 %v212_v7, %v210_v5  ;;  %v415_v11 = vpack.c.bf16 %v217_v9, %v215_v8  ;;  %v214_v12 = vld [vmem:[%s198_s21 + $0x20] sm:$0xff]  ;;  %v216_v13 = vld [vmem:[%s198_s21 + $0x30] sm:$0xff]  ;;  %v219_v14 = vld [vmem:[%s198_s21 + $0x48] sm:$0xff] }
  0x14   : > { %412 = vmatprep.subr.bf16.mxu0 %v411_v6  ;;  %v221_v15 = vld [vmem:[%s198_s21 + $0x58] sm:$0xff]  ;;  %v417_v16 = vpack.c.bf16 %v216_v13, %v214_v12  ;;  %v218_v18 = vld [vmem:[%s198_s21 + $0x40] sm:$0xff]  ;;  %v220_v19 = vld [vmem:[%s198_s21 + $0x50] sm:$0xff] }
  0x15   : > { %414 = vmatpush1.bf16.msra.mxu0 %v413_v10  ;;  %v419_v17 = vpack.c.bf16 %v221_v15, %v219_v14  ;;  %v223_v20 = vld [vmem:[%s198_s21 + $0x68] sm:$0xff]  ;;  %v225_v21 = vld [vmem:[%s198_s21 + $0x78] sm:$0xff]  ;;  %v421_v22 = vpack.c.bf16 %v220_v19, %v218_v18  ;;  %v222_v24 = vld [vmem:[%s198_s21 + $0x60] sm:$0xff] }
  0x16   : > { %416 = vmatprep.subr.bf16.mxu0 %v415_v11  ;;  %v423_v23 = vpack.c.bf16 %v225_v21, %v223_v20  ;;  %v224_v25 = vld [vmem:[%s198_s21 + $0x70] sm:$0xff] }
  0x17   : > { %v425_v26 = vpack.c.bf16 %v224_v25, %v222_v24 }
  0x19   : > { %418 = vmatpush1.bf16.msra.mxu0 %v417_v16 }
  0x1a   : > { %420 = vmatprep.subr.bf16.mxu0 %v419_v17 }
  0x1d   : > { %422 = vmatpush1.bf16.msra.mxu0 %v421_v22 }
  0x1e   : > { %424 = vmatprep.subr.bf16.mxu0 %v423_v23 }
  0x21   : > { %426 = vmatpush1.bf16.msra.mxu0 %v425_v26 }
  0x24   : > { %406 = vmatmul.mubr.msk.f32.vlgmr.msra.gmra.mrb[0].mxu0 %vm233_vm0, %v226_v27 }
  0x87   : > { %v231_v28 = vpop.permute.xlu0 %230 }
  0xf7   : > { %v303_v29 = vpop.f32.mrb[0].mxu0 }
  0xf8   : > { %v304_v30 = vadd.f32 %v303_v29, %v231_v28  ;;  %v305_v31 = vpop.f32.mrb[1].mxu0 }
  0xf9   : > { %v306_v32 = vadd.f32 %v305_v31, %v231_v28 }
  0xfa   : > { %308 = vst [vmem:[%s208_s27] sm:$0x3f] %v304_v30 }
  0xfb   : > { %309 = vst [vmem:[%s208_s27 + $0x8] sm:$0x3f] %v306_v32 }
  0xfc PF: > { %s13_s14 = sadd.s32 1, %s476_s14   ;;  %s547_s12 = smov %s472_s13 }
  0xfd   : > { %p10_p5 = scmp.ge.s32.totalorder %s13_s14, 4   ;;  %s548_s13 = smov %s550_s15 }
  0xff   :  { %12 = sbr.rel (!%p10_p5) target bundleno = 2 (0x2), region = 62 }

</bundles_post_ra>
